<compile_context>
chip_gen: v7x
topology: tpu7x:2x2x1
jax: 0.10.0
libtpu: 0.0.40
codegen_flags: <defaults>
</compile_context>

<pallas_src>
import math
from functools import partial

import jax
import jax.numpy as jnp
from jax.experimental import pallas as pl
from jax.experimental.pallas import tpu as pltpu


def _round_up(x: int, n: int) -> int:
    return ((x + n - 1) // n) * n


def _layer_stepper_kernel(z_ref, amp_ref, wf_ref, bf_ref, o_ref, *, S):
    # z_ref  : (1, TM, D)    tile of flattened spatial coords for this batch elem
    # amp_ref: (1, 1, S*D)   precomputed amplitude shift (lane-dense)
    # wf_ref : (D, D)        forward_linear weight, (in, out) layout
    # bf_ref : (1, D)        forward_linear bias
    # o_ref  : (1, TM, S*D)  lane-dense output tile
    z_next = jnp.dot(z_ref[0], wf_ref[...],
                     preferred_element_type=jnp.float32) + bf_ref[...]   # (TM, D)
    # Build (TM, S*D) directly: flat index s*D + d holds z_next[:, d] + amp[s, d].
    out = jnp.concatenate([z_next] * S, axis=-1) + amp_ref[0]            # (TM, S*D)
    o_ref[0] = out.astype(o_ref.dtype)


def layer_stepper(z, a, wf_t, bf, wc_t, bc, *, tm=512):
    """z: (..., H, W, 1, D), a: (..., 1, 1, S, C) -> (..., H, W, S, D)."""
    *lead, H, W, one, D = z.shape
    assert one == 1
    S, C, D2 = wc_t.shape
    assert D2 == D
    B = math.prod(lead) if lead else 1
    M = H * W
    SD = S * D

    zf = z.reshape(B, M, D)
    af = a.reshape(B, S, C)
    bf2 = bf.reshape(1, D)

    # Hoisted per-state code matmuls (tiny): amp[b, s, :] = a[b, s, :] @ Wc[s] + bc[s].
    amp = jnp.einsum("bsc,scd->bsd", af, wc_t,
                     preferred_element_type=jnp.float32) + bc            # (B, S, D)
    amp = amp.reshape(B, 1, SD).astype(z.dtype)                          # lane-dense

    # M tiling: TM multiple of 8, pad M up to a multiple of TM if needed.
    TM = min(tm, _round_up(M, 8))
    Mp = _round_up(M, TM)
    if Mp != M:
        zf = jnp.pad(zf, ((0, 0), (0, Mp - M), (0, 0)))

    grid = (B, Mp // TM)

    out = pl.pallas_call(
        partial(_layer_stepper_kernel, S=S),
        out_shape=jax.ShapeDtypeStruct((B, Mp, SD), z.dtype),
        grid=grid,
        in_specs=[
            pl.BlockSpec((1, TM, D), lambda b, m: (b, m, 0)),
            pl.BlockSpec((1, 1, SD), lambda b, m: (b, 0, 0)),
            pl.BlockSpec((D, D), lambda b, m: (0, 0)),
            pl.BlockSpec((1, D), lambda b, m: (0, 0)),
        ],
        out_specs=pl.BlockSpec((1, TM, SD), lambda b, m: (b, m, 0)),
        compiler_params=pltpu.CompilerParams(
            dimension_semantics=("parallel", "parallel")),
    )(zf, amp, wf_t, bf2)

    out = out[:, :M, :]
    return out.reshape(*lead, H, W, S, D)


def reference(z, a, wf_t, bf, wc_t, bc):
    # Pure-JAX reference of the PyTorch forward.
    z_next = jnp.einsum("...hwid,de->...hwie", z, wf_t) + bf          # (..., H, W, 1, D)
    amp = jnp.einsum("...ijsc,scd->...ijsd", a, wc_t) + bc            # (..., 1, 1, S, D)
    return z_next + amp                                               # (..., H, W, S, D)


if __name__ == "__main__":
    # Small shapes consistent with the module.
    batch, H, W = 2, 8, 8
    state_dim, hidden_dim, code_dim = 2, 32, 16

    key = jax.random.PRNGKey(0)
    k_z, k_a, k_wf, k_bf, k_wc, k_bc = jax.random.split(key, 6)

    z = jax.random.normal(k_z, (batch, H, W, 1, hidden_dim), jnp.float32)
    a = jax.random.normal(k_a, (batch, 1, 1, state_dim, code_dim), jnp.float32)

    # PyTorch Linear stores weight as (out, in); we pass the transposed
    # (in, out) layout for row-major matmul.
    wf_t = jax.random.normal(k_wf, (hidden_dim, hidden_dim), jnp.float32) * 0.05
    bf = jax.random.normal(k_bf, (hidden_dim,), jnp.float32) * 0.05
    wc_t = jax.random.normal(k_wc, (state_dim, code_dim, hidden_dim), jnp.float32) * 0.05
    bc = jax.random.normal(k_bc, (state_dim, hidden_dim), jnp.float32) * 0.05

    out = jax.jit(layer_stepper)(z, a, wf_t, bf, wc_t, bc)
    out = jax.block_until_ready(out)

    ref = reference(z, a, wf_t, bf, wc_t, bc)
    assert out.shape == (batch, H, W, state_dim, hidden_dim), out.shape
    assert jnp.allclose(out, ref, atol=1e-5, rtol=1e-5), "mismatch vs reference"

    print("KERNEL_OK")
</pallas_src>

<mosaic_0001>
module attributes {stable_mosaic.version = 11 : i64} {
  func.func @_layer_stepper_kernel(%arg0: i32, %arg1: i32, %arg2: memref<1x64x32xf32, #tpu.memory_space<vmem>>, %arg3: memref<1x1x64xf32, #tpu.memory_space<vmem>>, %arg4: memref<32x32xf32, #tpu.memory_space<vmem>>, %arg5: memref<1x32xf32, #tpu.memory_space<vmem>>, %arg6: memref<1x64x64xf32, #tpu.memory_space<vmem>>) attributes {dimension_semantics = [#tpu.dimension_semantics<parallel>, #tpu.dimension_semantics<parallel>], iteration_bounds = array<i64: 2, 1>, scalar_prefetch = 0 : i64, scratch_operands = 0 : i64, tpu.core_type = #tpu.core_type<tc>, window_params = [{transform_indices = @transform_0, window_bounds = array<i64: 1, 64, 32>}, {transform_indices = @transform_1, window_bounds = array<i64: 1, 1, 64>}, {pipeline_mode = #tpu.pipeline_mode<synchronous>, transform_indices = @transform_2, window_bounds = array<i64: 32, 32>}, {pipeline_mode = #tpu.pipeline_mode<synchronous>, transform_indices = @transform_3, window_bounds = array<i64: 1, 32>}, {transform_indices = @transform_4, window_bounds = array<i64: 1, 64, 64>}]} {
    %c0 = arith.constant 0 : index
    %c0_0 = arith.constant 0 : index
    %c0_1 = arith.constant 0 : index
    %0 = vector.load %arg2[%c0, %c0_0, %c0_1] : memref<1x64x32xf32, #tpu.memory_space<vmem>>, vector<1x64x32xf32>
    %1 = vector.shape_cast %0 : vector<1x64x32xf32> to vector<64x32xf32>
    %c0_2 = arith.constant 0 : index
    %c0_3 = arith.constant 0 : index
    %2 = vector.load %arg4[%c0_2, %c0_3] : memref<32x32xf32, #tpu.memory_space<vmem>>, vector<32x32xf32>
    %cst = arith.constant dense<0.000000e+00> : vector<64x32xf32>
    %3 = tpu.matmul %1, %2, %cst {dimension_numbers = #tpu.dot_dimension_numbers<[1], [0], [0], [1], [0, 0, 1, 1], [], []>} : vector<64x32xf32>, vector<32x32xf32>, vector<64x32xf32> -> vector<64x32xf32>
    %c0_4 = arith.constant 0 : index
    %c0_5 = arith.constant 0 : index
    %4 = vector.load %arg5[%c0_4, %c0_5] : memref<1x32xf32, #tpu.memory_space<vmem>>, vector<1x32xf32>
    %5 = vector.broadcast %4 : vector<1x32xf32> to vector<64x32xf32>
    %6 = arith.addf %3, %5 : vector<64x32xf32>
    %7 = tpu.concatenate %6, %6 in 1 : vector<64x32xf32>, vector<64x32xf32> -> vector<64x64xf32>
    %c0_6 = arith.constant 0 : index
    %c0_7 = arith.constant 0 : index
    %c0_8 = arith.constant 0 : index
    %8 = vector.load %arg3[%c0_6, %c0_7, %c0_8] : memref<1x1x64xf32, #tpu.memory_space<vmem>>, vector<1x1x64xf32>
    %9 = vector.shape_cast %8 : vector<1x1x64xf32> to vector<1x64xf32>
    %10 = vector.broadcast %9 : vector<1x64xf32> to vector<64x64xf32>
    %11 = arith.addf %7, %10 : vector<64x64xf32>
    %c0_9 = arith.constant 0 : index
    %c0_10 = arith.constant 0 : index
    %c0_11 = arith.constant 0 : index
    %12 = vector.load %arg6[%c0_9, %c0_10, %c0_11] : memref<1x64x64xf32, #tpu.memory_space<vmem>>, vector<1x64x64xf32>
    %13 = vector.shape_cast %12 : vector<1x64x64xf32> to vector<64x64xf32>
    %14 = vector.shape_cast %11 : vector<64x64xf32> to vector<1x64x64xf32>
    tpu.vector_store %arg6[%c0_9, %c0_10, %c0_11], %14 {strides = array<i32>} : memref<1x64x64xf32, #tpu.memory_space<vmem>>, vector<1x64x64xf32>,
    return
  }
  func.func @transform_0(%arg0: i32, %arg1: i32) -> (i32, i32, i32) {
    %c0_i32 = arith.constant 0 : i32
    %c0_i32_0 = arith.constant 0 : i32
    return %arg0, %arg1, %c0_i32 : i32, i32, i32
  }
  func.func @transform_1(%arg0: i32, %arg1: i32) -> (i32, i32, i32) {
    %c0_i32 = arith.constant 0 : i32
    %c0_i32_0 = arith.constant 0 : i32
    %c0_i32_1 = arith.constant 0 : i32
    return %arg0, %c0_i32, %c0_i32_0 : i32, i32, i32
  }
  func.func @transform_2(%arg0: i32, %arg1: i32) -> (i32, i32) {
    %c0_i32 = arith.constant 0 : i32
    %c0_i32_0 = arith.constant 0 : i32
    %c0_i32_1 = arith.constant 0 : i32
    return %c0_i32, %c0_i32_0 : i32, i32
  }
  func.func @transform_3(%arg0: i32, %arg1: i32) -> (i32, i32) {
    %c0_i32 = arith.constant 0 : i32
    %c0_i32_0 = arith.constant 0 : i32
    %c0_i32_1 = arith.constant 0 : i32
    return %c0_i32, %c0_i32_0 : i32, i32
  }
  func.func @transform_4(%arg0: i32, %arg1: i32) -> (i32, i32, i32) {
    %c0_i32 = arith.constant 0 : i32
    %c0_i32_0 = arith.constant 0 : i32
    return %arg0, %arg1, %c0_i32 : i32, i32, i32
  }
}

</mosaic_0001>

<bundles_post_ra>
// kernel: layer_stepper.1
= control target key start
LH: loop header
LB: loop body
LE: loop exit
PB: predicated region body
PF: predicated region fallthrough
CT: control target
= control target key end

     0   :  { %9 = vsyncpa [#allocation3], 0  ;;  %s1001_s0 = inlined_call_operand.hbm [shape: f32[2,64,32], index: 0, kind: input, shape index: {}]   ;;  %s1002_s1 = inlined_call_operand.vmem [shape: f32[2,1,64], index: 1, kind: input, shape index: {}]   ;;  %s1003_s2 = inlined_call_operand.vmem [shape: f32[32,32], index: 2, kind: input, shape index: {}]   ;;  %s1004_s3 = inlined_call_operand.vmem [shape: f32[1,32], index: 3, kind: input, shape index: {}]   ;;  %s1005_s4 = inlined_call_operand.vmem [shape: f32[2,64,64], index: 4, kind: output, shape index: {}]  }
   0x1   :  { %11 = vsyncpa [#allocation3 + $0x1], 0  ;;  %s815_s15 = smov 0   ;;  %s817_s16 = smov 0  }
   0x2   :  { %s819_s17 = smov 0   ;;  %s821_s18 = smov 0  }
   0x3   :  { %s823_s19 = smov 0   ;;  %s825_s20 = smov 0  }
   0x4 LB: > { %s577_s21 = sadd.s32 4294967295, %s784_s20   ;;  %s29_s22 = sadd.s32 1, %s780_s19  ;;  %s784_s20 = sphi %s825_s20, %s17_s20   ;;  %s780_s19 = sphi %s823_s19, %s1013_s19   ;;  %s776_s18 = sphi %s821_s18, %s1012_s18   ;;  %s772_s17 = sphi %s819_s17, %s1011_s17   ;;  %s768_s16 = sphi %s817_s16, %s1010_s16   ;;  %s764_s15 = sphi %s815_s15, %s1009_s15  }
   0x5   : > { %p31_p0 = scmp.ge.s32.totalorder %s29_s22, 2  ;;  %s38_s23 = sadd.s32 1, %s772_s17 }
   0x6   : > { %p45_p1 = scmp.ne.s32.totalorder %s772_s17, %s768_s16  ;;  %p46_p2 = scmp.eq.s32.totalorder %s784_s20, 0 }
   0x7   : > { %s1015_s22 = smov (%p31_p0, %s29_s22), 0  ;;  %p51_p4 = scmp.ne.s32.totalorder %s768_s16, %s764_s15 }
   0x8   : > { %p851_p3 = por %p46_p2, %p45_p1  ;;  %s33_s25 = ssub.s32 %s780_s19, %s1015_s22 }
   0x9   : > { %p52_p5 = scmp.eq.s32.totalorder %s577_s21, 0  ;;  %p36_p6 = scmp.eq.s32.totalorder %s33_s25, 0 }
   0xa   : > { %p652_p8 = scmp.lt.s32.totalorder %s784_s20, 2  ;;  %s177_s28 = sand.u32 1, %s772_s17  }
   0xb   : > { %p858_p7 = por %p52_p5, %p51_p4  ;;  %s600_s29 = sshll.u32 %s780_s19, 10 }
   0xc   : > { %s864_s27 = scalar_select %p36_p6, %s772_s17, %s38_s23  }
   0xd   : > { %s581_s30 = sshll.u32 %s177_s28, 6  ;;  %s871_s7 = scalar_lea.hbm %s1001_s0, %s600_s29 }
   0xe   : > { %s181_s8 = scalar_lea.vmem [#allocation2], %s581_s30  ;;  %p875_p9 = pnand %p652_p8, %p851_p3 }
   0xf   : > { %s190_s9 = sshll.u32 %s181_s8, 4  ;;  %s881_s11 = scalar_lea.sflag [#allocation3], %s177_s28  ;;  %s879_s9 = int_to_ptr.vmem [resolvable:$true] %s190_s9 }
  0x10   : > { %s704_s12 = scalar_lea.hbm %s871_s7, 1024  ;;  %p706_p11 = pneg %p875_p9 }
  0x11   : > { %p705_p10 = scmp.ne.s32.totalorder %s871_s7, %s704_s12  ;;  %s709_s15 = scalar_lea.hbm %s1001_s0, 2048 }
  0x12   : > { %p710_p0 = scmp.lt.u32.totalorder %s871_s7, %s1001_s0  ;;  %p711_p1 = scmp.lt.u32.totalorder %s709_s15, %s704_s12 }
  0x13   : > { %p707_p12 = pnand %p706_p11, %p705_p10  ;;  %p713_p3 = scmp.lt.u32.totalorder %s704_s12, %s871_s7 }
  0x14   : > { %p712_p2 = por %p711_p1, %p710_p0 }
  0x15   : > { %p708_p13 = pneg %p707_p12 }
  0x16   : > { %p714_p4 = por %p713_p3, %p712_p2 }
  0x18   : > { %p715_p5 = pnand %p714_p4, %p708_p13 }
  0x1a   : > { %718 = shalt.err (!%p715_p5)
}
  0x1b   : > { %s719_s24 = scalar_lea.vmem %s879_s9, 1024  ;;  %s786_s25 = smov [#allocation2]  }
  0x1c   : > { %p720_p6 = scmp.ne.s32.totalorder %s879_s9, %s719_s24  ;;  %s724_s28 = sshll.u32 %s786_s25, 4  ;;  %s725_s28 = int_to_ptr.vmem [resolvable:$false] %s724_s28 }
  0x1d   : > { %s726_s29 = scalar_lea.vmem %s725_s28, 2048  ;;  %p727_p12 = scmp.lt.s32.totalorder %s879_s9, %s725_s28 }
  0x1e   : > { %p722_p8 = pnand %p720_p6, %p706_p11  ;;  %p728_p0 = scmp.lt.s32.totalorder %s726_s29, %s719_s24 }
  0x20   : > { %p723_p10 = pneg %p722_p8  ;;  %p729_p1 = por %p728_p0, %p727_p12 }
  0x22   : > { %p730_p2 = pnand %p729_p1, %p723_p10 }
  0x24   : > { %733 = shalt.err (!%p730_p2)
}
  0x25   : > { %s787_s30 = smov 128   ;;  %s788_s5 = smov 8  }
  0x26   : > { %651 = dma.hbm_to_vmem [thread:$0]  (!%p875_p9), %s871_s7, 1024, %s879_s9, %s881_s11, %s787_s30, %s787_s30, %s788_s5  }
  0x27   : > { %p584_p11 = scmp.ge.s32.totalorder %s784_s20, 1  ;;  %p204_p13 = scmp.lt.s32.totalorder %s784_s20, 3 }
  0x29   : > { %p205_p3 = pnand %p584_p11, %p204_p13 }
  0x2a   : > { %s210_s6 = sand.u32 (!%p205_p3), 1, %s768_s16  }
  0x2b   : > { %208 = sbr.rel (%p205_p3) target bundleno = 408 (0x198), region = 36  ;;  %s585_s8 = sshll.u32 (!%p205_p3), %s210_s6, 6 }
  0x2c   : > { %s211_s12 = scalar_lea.sflag (!%p205_p3), [#allocation3], %s210_s6  ;;  %s912_s13 = scalar_lea.vmem (!%p205_p3), [#allocation2], %s585_s8 }
  0x32   : > { %759 = dma.done.wait (%p858_p7), %s211_s12, 1024  }
  0x33   : > { %761 = vsyncadd (%p858_p7), %s211_s12, 4294966272  ;;  %vm279_vm0 = vcmask 261120   ;;  %v268_v0 = vld [vmem:[%s1003_s2] sm:$0xff]  ;;  %v269_v1 = vld [vmem:[%s1003_s2 + $0x8] sm:$0xff]  ;;  %s789_s25 = smov 32   ;;  %p247_p7 = scmp.lt.s32.totalorder %s776_s18, 1 }
  0x34   : > { %v270_v2 = vld [vmem:[%s1003_s2 + $0x10] sm:$0xff]  ;;  %v634_v3 = vpack.c.bf16 %v269_v1, %v268_v0  ;;  %v271_v4 = vld [vmem:[%s1003_s2 + $0x18] sm:$0xff]  ;;  %v260_v5 = vld [vmem:[%s912_s13] sm:$0xff]  ;;  %vm464_vm1 = vcmask 523264  }
  0x35   : > { %v264_v6 = vld [vmem:[%s912_s13 + $0x20] sm:$0xff]  ;;  %v638_v7 = vpack.c.bf16 %v271_v4, %v270_v2  ;;  %622 = vmatprep.mubr.msk.f32.mxu0 %vm279_vm0, %v260_v5  ;;  %v261_v8 = vld [vmem:[%s912_s13 + $0x8] sm:$0xff]  ;;  %v262_v10 = vld [vmem:[%s912_s13 + $0x10] sm:$0xff]  ;;  %s1017_s18 = smov (!%p247_p7, %s776_s18), 1 }
  0x36   : > { %628 = vmatprep.mubr.msk.f32.mxu1 %vm279_vm0, %v264_v6  ;;  %635 = vmatprep.subr.bf16.mxu0 %v634_v3  ;;  %v265_v9 = vld [vmem:[%s912_s13 + $0x28] sm:$0xff]  ;;  %v266_v11 = vld [vmem:[%s912_s13 + $0x30] sm:$0xff]  ;;  %v263_v12 = vld [vmem:[%s912_s13 + $0x18] sm:$0xff]  ;;  %s249_s30 = scalar_lea.vmem %s1002_s1, %s1017_s18  ;;  %s601_s5 = sshll.u32 %s1017_s18, 6 }
  0x37   : > { %642 = vmatprep.subr.bf16.mxu1 %v634_v3  ;;  %637 = vmatpush3.bf16.msra.mxu0 %v634_v3  ;;  %v267_v13 = vld [vmem:[%s912_s13 + $0x38] sm:$0xff]  ;;  %v588_v14 = vld [vmem:[%s1004_s3] ss:$0 sm:$0xff]  ;;  %s957_s12 = scalar_lea.vmem %s1005_s4, %s601_s5 }
  0x38   : > { %644 = vmatpush3.bf16.msra.mxu1 %v634_v3  ;;  %639 = vmatprep.subr.bf16.mxu0 %v638_v7  ;;  %v597_v31 = vld [vmem:[%s249_s30] ss:$0 sm:$0xff] }
  0x39   : > { %643 = vmatprep.subr.bf16.mxu1 %v638_v7 }
  0x3b   : > { %641 = vmatpush3.bf16.msra.mxu0 %v638_v7 }
  0x3c   : > { %645 = vmatpush3.bf16.msra.mxu1 %v638_v7 }
  0x3e   : > { %623 = vmatmul.mubr.msk.f32.vlgmr.msra.gmra.mrb[0].mxu0 %vm279_vm0, %v261_v8 }
  0x3f   : > { %629 = vmatmul.mubr.msk.f32.vlgmr.msra.gmra.mrb[0].mxu1 %vm279_vm0, %v265_v9  ;;  %625 = vmatprep.mubr.msk.f32.mxu0 %vm279_vm0, %v262_v10 }
  0x40   : > { %631 = vmatprep.mubr.msk.f32.mxu1 %vm279_vm0, %v266_v11 }
  0x42   : > { %626 = vmatmul.mubr.msk.f32.gmra.mrb[2].mxu0 %vm279_vm0, %v263_v12 }
  0x43   : > { %632 = vmatmul.mubr.msk.f32.gmra.mrb[2].mxu1 %vm279_vm0, %v267_v13 }
 0x111   : > { %v624_v15 = vpop.f32.mrb[0].mxu0 }
 0x112   : > { %v630_v16 = vpop.f32.mrb[0].mxu1  ;;  %v376_v17 = vadd.f32 %v624_v15, %v588_v14  ;;  %v370_v19 = vpop.f32.mrb[1].mxu0 }
 0x113   : > { %v396_v18 = vadd.f32 %v630_v16, %v588_v14  ;;  %v390_v20 = vpop.f32.mrb[1].mxu1  ;;  %v371_v23 = vadd.f32 %v588_v14, %v370_v19 }
 0x114   : > { %419 = vrot.lane.b32.xlu0 %v376_v17, %s789_s25  ;;  %v391_v27 = vadd.f32 %v588_v14, %v390_v20 }
 0x115   : > { %427 = vrot.lane.b32.xlu1 %v396_v18, %s789_s25  ;;  %v627_v21 = vpop.f32.mrb[2].mxu0 }
 0x116   : > { %v633_v22 = vpop.f32.mrb[2].mxu1  ;;  %v386_v24 = vadd.f32 %v627_v21, %v588_v14  ;;  %v380_v25 = vpop.f32.mrb[3].mxu0 }
 0x117   : > { %v400_v26 = vpop.f32.mrb[3].mxu1  ;;  %v381_v28 = vadd.f32 %v588_v14, %v380_v25  ;;  %v406_v29 = vadd.f32 %v633_v22, %v588_v14 }
 0x118   : > { %417 = vrot.lane.b32.xlu0 %v371_v23, %s789_s25  ;;  %v401_v30 = vadd.f32 %v588_v14, %v400_v26 }
 0x119   : > { %423 = vrot.lane.b32.xlu1 %v386_v24, %s789_s25 }
 0x11c   : > { %425 = vrot.lane.b32.xlu0 %v391_v27, %s789_s25 }
 0x11d   : > { %421 = vrot.lane.b32.xlu1 %v381_v28, %s789_s25 }
 0x120   : > { %429 = vrot.lane.b32.xlu0 %v401_v30, %s789_s25 }
 0x121   : > { %431 = vrot.lane.b32.xlu1 %v406_v29, %s789_s25 }
 0x186   : > { %v420_v33 = vpop.permute.xlu0 %419 }
 0x187   : > { %v428_v32 = vpop.permute.xlu1 %427  ;;  %v442_v35 = vsel %vm279_vm0, %v376_v17, %v420_v33 }
 0x188   : > { %v446_v34 = vsel %vm279_vm0, %v396_v18, %v428_v32  ;;  %v457_v37 = vadd.f32 %v597_v31, %v442_v35 }
 0x189   : > { %v461_v36 = vadd.f32 %v597_v31, %v446_v34 }
 0x18a   : > { %466 = vst.msk [vmem:[%s957_s12 + $0x8] sm:$0xff] %vm464_vm1, %v457_v37  ;;  %v418_v39 = vpop.permute.xlu0 %417 }
 0x18b   : > { %470 = vst.msk [vmem:[%s957_s12 + $0x28] sm:$0xff] %vm464_vm1, %v461_v36  ;;  %v424_v38 = vpop.permute.xlu1 %423  ;;  %v441_v41 = vsel %vm279_vm0, %v371_v23, %v418_v39 }
 0x18c   : > { %v444_v40 = vsel %vm279_vm0, %v386_v24, %v424_v38  ;;  %v456_v43 = vadd.f32 %v597_v31, %v441_v41 }
 0x18d   : > { %v459_v42 = vadd.f32 %v597_v31, %v444_v40 }
 0x18e   : > { %465 = vst.msk [vmem:[%s957_s12] sm:$0xff] %vm464_vm1, %v456_v43  ;;  %v426_v45 = vpop.permute.xlu0 %425 }
 0x18f   : > { %468 = vst.msk [vmem:[%s957_s12 + $0x18] sm:$0xff] %vm464_vm1, %v459_v42  ;;  %v422_v44 = vpop.permute.xlu1 %421  ;;  %v445_v47 = vsel %vm279_vm0, %v391_v27, %v426_v45 }
 0x190   : > { %v443_v46 = vsel %vm279_vm0, %v381_v28, %v422_v44  ;;  %v460_v49 = vadd.f32 %v597_v31, %v445_v47 }
 0x191   : > { %v458_v48 = vadd.f32 %v597_v31, %v443_v46 }
 0x192   : > { %469 = vst.msk [vmem:[%s957_s12 + $0x20] sm:$0xff] %vm464_vm1, %v460_v49  ;;  %v430_v51 = vpop.permute.xlu0 %429 }
 0x193   : > { %467 = vst.msk [vmem:[%s957_s12 + $0x10] sm:$0xff] %vm464_vm1, %v458_v48  ;;  %v432_v50 = vpop.permute.xlu1 %431  ;;  %v447_v53 = vsel %vm279_vm0, %v401_v30, %v430_v51 }
 0x194   : > { %v448_v52 = vsel %vm279_vm0, %v406_v29, %v432_v50  ;;  %v462_v55 = vadd.f32 %v597_v31, %v447_v53 }
 0x195   : > { %v463_v54 = vadd.f32 %v597_v31, %v448_v52 }
 0x196   : > { %471 = vst.msk [vmem:[%s957_s12 + $0x30] sm:$0xff] %vm464_vm1, %v462_v55 }
 0x197   : > { %472 = vst.msk [vmem:[%s957_s12 + $0x38] sm:$0xff] %vm464_vm1, %v463_v54 }
 0x198 PF: > { %s17_s20 = sadd.s32 1, %s784_s20   ;;  %s1009_s15 = smov %s768_s16 }
 0x199   : > { %p14_p9 = scmp.ge.s32.totalorder %s17_s20, 4   ;;  %s1010_s16 = smov %s772_s17 }
 0x19a   : > { %s1011_s17 = smov %s864_s27  ;;  %s1012_s18 = smov %s780_s19 }
 0x19b   : > { %s1013_s19 = smov %s1015_s22  ;;  %16 = sbr.rel (!%p14_p9) target bundleno = 4 (0x4), region = 79 }
 0x1a2   :  { %503 = vsyncpa [#allocation3], 1 }
 0x1a3   :  { %505 = vsyncpa [#allocation3 + $0x1], 1 }

</bundles_post_ra>
